<compile_context>
chip_gen: v7x
topology: tpu7x:2x2x1
jax: 0.10.0
libtpu: 0.0.40
codegen_flags: <defaults>
</compile_context>

<pallas_src>
import functools

import jax
import jax.numpy as jnp
from jax import lax
from jax.experimental import pallas as pl
from jax.experimental.pallas import tpu as pltpu


# ----------------------------------------------------------------------------
# Kernel
# ----------------------------------------------------------------------------
def maxout_kernel(x_ref, w_ref, b_ref, o_ref, *, out_features, num_pieces):
    # x_ref: (B_TILE, C, TILE_M)   -- pixels on the lane axis
    # w_ref: (P*O, C)              -- piece-major stacked weights (row = p*O+o)
    # b_ref: (P*O, 1)              -- piece-major bias (broadcast over lanes)
    # o_ref: (B_TILE, O, TILE_M)
    O, P = out_features, num_pieces
    b_tile = x_ref.shape[0]

    w = w_ref[...]          # resident tiny weights, hoisted out of the loop
    bias = b_ref[...]

    def one_batch(bi):
        x = x_ref[bi]                                            # (C, TILE_M)
        # Single fused (P*O, C) @ (C, TILE_M) MXU push (one push of P*O rows
        # instead of P pushes of O rows).
        y = jnp.dot(w, x, preferred_element_type=jnp.float32) + bias
        acc = y[0:O]
        for p in range(1, P):                                    # static, tiny
            acc = jnp.maximum(acc, y[p * O:(p + 1) * O])
        o_ref[bi] = acc.astype(o_ref.dtype)

    if b_tile <= 8:
        # short static unroll -> full LLO scheduler visibility
        for bi in range(b_tile):
            one_batch(bi)
    else:
        def body(bi, carry):
            one_batch(bi)
            return carry
        lax.fori_loop(0, b_tile, body, 0)


# ----------------------------------------------------------------------------
# Tiling heuristics
# ----------------------------------------------------------------------------
def _ceil_to(v, m):
    return -(-v // m) * m


def _choose_tiling(n, hw_pad, c, o, vmem_budget_bytes=24 << 20):
    """Pick (b_tile, tile_m) so each grid step moves as many pixels as the VMEM
    budget allows (the kernel is overhead/HBM-bound), while keeping >=2 grid
    steps when possible for v7x megacore."""
    # Per-pixel VMEM cost: double-buffered f32 input (C padded to 8 sublanes)
    # plus double-buffered f32 output (O padded to 8 sublanes).
    bytes_per_pixel = 2 * 4 * (_ceil_to(c, 8) + _ceil_to(o, 8))
    max_pixels = max(128, (vmem_budget_bytes // bytes_per_pixel) // 128 * 128)

    # Largest 128-multiple divisor of hw_pad that fits the budget.
    tile_m = min(hw_pad, max_pixels)
    tile_m -= tile_m % 128
    while hw_pad % tile_m != 0:
        tile_m -= 128

    # Fold batch into the block to use the remaining pixel budget.
    b_cap = max(1, max_pixels // tile_m)
    b_tile = 1
    for cand in range(min(n, b_cap), 0, -1):
        if n % cand == 0:
            b_tile = cand
            break

    # Keep >= 2 grid steps so both v7x TensorCores get work.
    if (n // b_tile) * (hw_pad // tile_m) == 1:
        if b_tile > 1:
            for cand in range(b_tile - 1, 0, -1):
                if n % cand == 0:
                    b_tile = cand
                    break
        elif tile_m > 128:
            for cand in range(tile_m - 128, 0, -128):
                if hw_pad % cand == 0:
                    tile_m = cand
                    break
    return b_tile, tile_m


# ----------------------------------------------------------------------------
# Parameter prep (run once at init time, not per forward)
# ----------------------------------------------------------------------------
def prepare_maxout_params(conv_w, conv_b, out_features, num_pieces):
    """torch Conv2d (O*P, C, 1, 1)/(O*P,) -> piece-major stacked (P*O, C)/(P*O, 1).

    Torch channel index for (o, p) is o*P + p; stacked row index is p*O + o."""
    O, P = out_features, num_pieces
    C = conv_w.shape[1]
    w_stacked = conv_w.reshape(O, P, C).transpose(1, 0, 2).reshape(P * O, C)
    b_stacked = conv_b.reshape(O, P).T.reshape(P * O, 1)
    return w_stacked, b_stacked


# ----------------------------------------------------------------------------
# Forward
# ----------------------------------------------------------------------------
def maxout_layer(x_nchw, w_stacked, b_stacked, out_features, num_pieces):
    """x_nchw: (N, C, H, W) f32; returns (N, out_features, H, W)."""
    N, C, H, W = x_nchw.shape
    O, P = out_features, num_pieces
    HW = H * W

    # free reshape NCHW -> (N, C, H*W); pad pixels to a 128 multiple if needed
    x3d = x_nchw.reshape(N, C, HW)
    HW_pad = _ceil_to(HW, 128)
    if HW_pad != HW:
        x3d = jnp.pad(x3d, ((0, 0), (0, 0), (0, HW_pad - HW)))

    b_tile, tile_m = _choose_tiling(N, HW_pad, C, O)
    grid = (N // b_tile, HW_pad // tile_m)

    M = N * HW_pad
    cost = pl.CostEstimate(
        flops=2 * M * C * O * P,
        transcendentals=0,
        bytes_accessed=4 * (M * (C + O) + P * O * C + P * O),
    )

    kern = functools.partial(maxout_kernel, out_features=O, num_pieces=P)
    out3d = pl.pallas_call(
        kern,
        out_shape=jax.ShapeDtypeStruct((N, O, HW_pad), x_nchw.dtype),
        grid=grid,
        in_specs=[
            pl.BlockSpec((b_tile, C, tile_m), lambda n, i: (n, 0, i)),
            pl.BlockSpec((P * O, C), lambda n, i: (0, 0)),   # resident weights
            pl.BlockSpec((P * O, 1), lambda n, i: (0, 0)),   # resident bias
        ],
        out_specs=pl.BlockSpec((b_tile, O, tile_m), lambda n, i: (n, 0, i)),
        compiler_params=pltpu.CompilerParams(
            dimension_semantics=("parallel", "parallel")),
        cost_estimate=cost,
    )(x3d, w_stacked, b_stacked)

    if HW_pad != HW:
        out3d = out3d[:, :, :HW]
    return out3d.reshape(N, O, H, W)


# ----------------------------------------------------------------------------
# Pure-JAX reference (mirrors the PyTorch forward exactly)
# ----------------------------------------------------------------------------
def maxout_reference(x_nchw, conv_w, conv_b, out_features, num_pieces):
    N, C, H, W = x_nchw.shape
    OP = out_features * num_pieces
    y = jnp.einsum('nchw,oc->nohw', x_nchw, conv_w.reshape(OP, C))
    y = y + conv_b.reshape(1, OP, 1, 1)
    y = y.reshape(N, out_features, num_pieces, H, W)
    return jnp.max(y, axis=2)


if __name__ == "__main__":
    batch, in_features, spatial = 2, 4, 16
    out_features, num_pieces = 8, 4

    key = jax.random.PRNGKey(0)
    kx, kw, kb = jax.random.split(key, 3)

    x = jax.random.normal(kx, (batch, in_features, spatial, spatial),
                          dtype=jnp.float32)
    # Synthetic Conv2d(in_features, out_features*num_pieces, k=1) params
    fan_in = in_features  # kernel_size = 1
    bound = 1.0 / (fan_in ** 0.5)
    conv_w = jax.random.uniform(
        kw, (out_features * num_pieces, in_features, 1, 1),
        minval=-bound, maxval=bound, dtype=jnp.float32)
    conv_b = jax.random.uniform(
        kb, (out_features * num_pieces,),
        minval=-bound, maxval=bound, dtype=jnp.float32)

    # one-time parameter reshuffle (init-time, not per forward)
    w_stacked, b_stacked = prepare_maxout_params(
        conv_w, conv_b, out_features, num_pieces)

    out = maxout_layer(x, w_stacked, b_stacked, out_features, num_pieces)
    out = jax.block_until_ready(out)

    ref = maxout_reference(x, conv_w, conv_b, out_features, num_pieces)
    assert out.shape == (batch, out_features, spatial, spatial), out.shape
    assert jnp.allclose(out, ref, atol=1e-5, rtol=1e-5), "mismatch vs reference"

    print("KERNEL_OK")
</pallas_src>

<mosaic_0001>
module attributes {stable_mosaic.version = 11 : i64} {
  func.func @maxout_kernel(%arg0: i32, %arg1: i32, %arg2: memref<1x4x256xf32, #tpu.memory_space<vmem>>, %arg3: memref<32x4xf32, #tpu.memory_space<vmem>>, %arg4: memref<32x1xf32, #tpu.memory_space<vmem>>, %arg5: memref<1x8x256xf32, #tpu.memory_space<vmem>>) attributes {dimension_semantics = [#tpu.dimension_semantics<parallel>, #tpu.dimension_semantics<parallel>], iteration_bounds = array<i64: 2, 1>, scalar_prefetch = 0 : i64, scratch_operands = 0 : i64, tpu.core_type = #tpu.core_type<tc>, window_params = [{transform_indices = @transform_0, window_bounds = array<i64: 1, 4, 256>}, {pipeline_mode = #tpu.pipeline_mode<synchronous>, transform_indices = @transform_1, window_bounds = array<i64: 32, 4>}, {pipeline_mode = #tpu.pipeline_mode<synchronous>, transform_indices = @transform_2, window_bounds = array<i64: 32, 1>}, {transform_indices = @transform_3, window_bounds = array<i64: 1, 8, 256>}]} {
    %c0 = arith.constant 0 : index
    %c0_0 = arith.constant 0 : index
    %0 = vector.load %arg3[%c0, %c0_0] : memref<32x4xf32, #tpu.memory_space<vmem>>, vector<32x4xf32>
    %c0_1 = arith.constant 0 : index
    %c0_2 = arith.constant 0 : index
    %1 = vector.load %arg4[%c0_1, %c0_2] : memref<32x1xf32, #tpu.memory_space<vmem>>, vector<32x1xf32>
    %c0_3 = arith.constant 0 : index
    %c0_4 = arith.constant 0 : index
    %c0_5 = arith.constant 0 : index
    %2 = vector.load %arg2[%c0_3, %c0_4, %c0_5] : memref<1x4x256xf32, #tpu.memory_space<vmem>>, vector<1x4x256xf32>
    %3 = vector.shape_cast %2 : vector<1x4x256xf32> to vector<4x256xf32>
    %cst = arith.constant dense<0.000000e+00> : vector<32x256xf32>
    %4 = tpu.matmul %0, %3, %cst {dimension_numbers = #tpu.dot_dimension_numbers<[1], [0], [0], [1], [0, 0, 1, 1], [], []>} : vector<32x4xf32>, vector<4x256xf32>, vector<32x256xf32> -> vector<32x256xf32>
    %5 = vector.broadcast %1 : vector<32x1xf32> to vector<32x256xf32>
    %6 = arith.addf %4, %5 : vector<32x256xf32>
    %7 = vector.extract_strided_slice %6 {offsets = [0, 0], sizes = [8, 256], strides = [1, 1]} : vector<32x256xf32> to vector<8x256xf32>
    %8 = vector.extract_strided_slice %6 {offsets = [8, 0], sizes = [8, 256], strides = [1, 1]} : vector<32x256xf32> to vector<8x256xf32>
    %9 = arith.maximumf %7, %8 : vector<8x256xf32>
    %10 = vector.extract_strided_slice %6 {offsets = [16, 0], sizes = [8, 256], strides = [1, 1]} : vector<32x256xf32> to vector<8x256xf32>
    %11 = arith.maximumf %9, %10 : vector<8x256xf32>
    %12 = vector.extract_strided_slice %6 {offsets = [24, 0], sizes = [8, 256], strides = [1, 1]} : vector<32x256xf32> to vector<8x256xf32>
    %13 = arith.maximumf %11, %12 : vector<8x256xf32>
    %c0_6 = arith.constant 0 : index
    %c0_7 = arith.constant 0 : index
    %c0_8 = arith.constant 0 : index
    %14 = vector.load %arg5[%c0_6, %c0_7, %c0_8] : memref<1x8x256xf32, #tpu.memory_space<vmem>>, vector<1x8x256xf32>
    %15 = vector.shape_cast %14 : vector<1x8x256xf32> to vector<8x256xf32>
    %16 = vector.shape_cast %13 : vector<8x256xf32> to vector<1x8x256xf32>
    tpu.vector_store %arg5[%c0_6, %c0_7, %c0_8], %16 {strides = array<i32>} : memref<1x8x256xf32, #tpu.memory_space<vmem>>, vector<1x8x256xf32>,
    return
  }
  func.func @transform_0(%arg0: i32, %arg1: i32) -> (i32, i32, i32) {
    %c0_i32 = arith.constant 0 : i32
    %c0_i32_0 = arith.constant 0 : i32
    return %arg0, %c0_i32, %arg1 : i32, i32, i32
  }
  func.func @transform_1(%arg0: i32, %arg1: i32) -> (i32, i32) {
    %c0_i32 = arith.constant 0 : i32
    %c0_i32_0 = arith.constant 0 : i32
    %c0_i32_1 = arith.constant 0 : i32
    return %c0_i32, %c0_i32_0 : i32, i32
  }
  func.func @transform_2(%arg0: i32, %arg1: i32) -> (i32, i32) {
    %c0_i32 = arith.constant 0 : i32
    %c0_i32_0 = arith.constant 0 : i32
    %c0_i32_1 = arith.constant 0 : i32
    return %c0_i32, %c0_i32_0 : i32, i32
  }
  func.func @transform_3(%arg0: i32, %arg1: i32) -> (i32, i32, i32) {
    %c0_i32 = arith.constant 0 : i32
    %c0_i32_0 = arith.constant 0 : i32
    return %arg0, %c0_i32, %arg1 : i32, i32, i32
  }
}

</mosaic_0001>

<bundles_post_ra>
// kernel: tpu_custom_call.1
= control target key start
LH: loop header
LB: loop body
LE: loop exit
PB: predicated region body
PF: predicated region fallthrough
CT: control target
= control target key end

     0   :  { %8 = vsyncpa [#allocation3], 0  ;;  %s765_s0 = inlined_call_operand.vmem [shape: f32[2,4,256], index: 0, kind: input, shape index: {}]   ;;  %s766_s1 = inlined_call_operand.vmem [shape: f32[32,4], index: 1, kind: input, shape index: {}]   ;;  %s767_s2 = inlined_call_operand.vmem [shape: f32[32,1], index: 2, kind: input, shape index: {}]   ;;  %s768_s3 = inlined_call_operand.hbm [shape: f32[2,8,256], index: 3, kind: output, shape index: {}]  }
   0x1   :  { %10 = vsyncpa [#allocation3 + $0x1], 0  ;;  %s625_s12 = smov 0   ;;  %s627_s13 = smov 0  }
   0x2   :  { %s629_s14 = smov 0   ;;  %s631_s15 = smov 0  }
   0x3   :  { %s633_s16 = smov 0   ;;  %s635_s17 = smov 0  }
   0x4 LB: > { %s439_s18 = sadd.s32 4294967295, %s600_s17   ;;  %s440_s19 = sadd.s32 4294967294, %s600_s17   ;;  %s600_s17 = sphi %s635_s17, %s16_s17   ;;  %s596_s16 = sphi %s633_s16, %s775_s16   ;;  %s592_s15 = sphi %s631_s15, %s774_s15   ;;  %s588_s14 = sphi %s629_s14, %s773_s14   ;;  %s584_s13 = sphi %s627_s13, %s772_s13   ;;  %s580_s12 = sphi %s625_s12, %s771_s12  }
   0x5   : > { %s28_s20 = sadd.s32 1, %s596_s16  ;;  %s107_s21 = sadd.s32 1, %s588_s14 }
   0x6   : > { %p30_p0 = scmp.ge.s32.totalorder %s28_s20, 2  ;;  %p117_p1 = scmp.ne.s32.totalorder %s588_s14, %s584_s13 }
   0x7   : > { %p118_p2 = scmp.eq.s32.totalorder %s439_s18, 1  ;;  %p123_p3 = scmp.ne.s32.totalorder %s584_s13, %s580_s12 }
   0x8   : > { %s777_s20 = smov (%p30_p0, %s28_s20), 0  ;;  %p124_p5 = scmp.eq.s32.totalorder %s440_s19, 1 }
   0x9   : > { %p665_p4 = por %p118_p2, %p117_p1  ;;  %s102_s23 = ssub.s32 %s596_s16, %s777_s20 }
   0xa   : > { %p443_p6 = scmp.ge.s32.totalorder %s600_s17, 1  ;;  %p105_p7 = scmp.eq.s32.totalorder %s102_s23, 0 }
   0xb   : > { %p672_p8 = por %p124_p5, %p123_p3  ;;  %p161_p9 = scmp.lt.s32.totalorder %s600_s17, 3 }
   0xc   : > { %s678_s25 = scalar_select %p105_p7, %s588_s14, %s107_s21  }
   0xd   : > { %p162_p10 = pnand %p443_p6, %p161_p9 }
   0xe   : > { %p190_p11 = scmp.lt.s32.totalorder (!%p162_p10), %s592_s15, 1  ;;  %v602_v0 = vmov (!%p162_p10), 0.0   ;;  %v204_v1 = vld [vmem:[%s767_s2] sm:$0xff] (!%p162_p10)  ;;  %v603_v2 = vmov (!%p162_p10), 0   ;;  %v206_v3 = vld [vmem:[%s767_s2 + $0x10] sm:$0xff] (!%p162_p10)  ;;  %v205_v4 = vld [vmem:[%s767_s2 + $0x8] sm:$0xff] (!%p162_p10) }
   0xf   : > { %165 = sbr.rel (%p162_p10) target bundleno = 270 (0x10e), region = 32  ;;  %313 = vmatprep.mubr.f32.mxu0 (!%p162_p10), %v602_v0  ;;  %325 = vmatprep.mubr.f32.mxu1 (!%p162_p10), %v602_v0  ;;  %v207_v5 = vld [vmem:[%s767_s2 + $0x18] sm:$0xff] (!%p162_p10)  ;;  %vm244_vm0 = vcmask (!%p162_p10), 1043456   ;;  %v200_v8 = vld [vmem:[%s766_s1] sm:$0xff] (!%p162_p10)  ;;  %vm231_vm1 = vcmask (!%p162_p10), 31744   ;;  %v202_v9 = vld [vmem:[%s766_s1 + $0x10] sm:$0xff] (!%p162_p10) }
  0x10   : > { %519 = vset.pattern.permute.xlu0 (!%p162_p10), %v603_v2  ;;  %520 = vset.pattern.permute.xlu1 (!%p162_p10), %v603_v2  ;;  %v201_v10 = vld [vmem:[%s766_s1 + $0x8] sm:$0xff] (!%p162_p10)  ;;  %v203_v11 = vld [vmem:[%s766_s1 + $0x18] sm:$0xff] (!%p162_p10)  ;;  %s186_s30 = sand.u32 (!%p162_p10), 1, %s584_s13   ;;  %s459_s5 = sshll.u32 (!%p162_p10), %s592_s15, 8 }
  0x11   : > { %211 = vperm.xlu0 (!%p162_p10), %519, %v204_v1   ;;  %221 = vperm.xlu1 (!%p162_p10), %520, %v206_v3   ;;  %s716_s10 = scalar_lea.hbm (!%p162_p10), %s768_s3, %s459_s5  ;;  %s604_s18 = smov (!%p162_p10), [#allocation2]  }
  0x12   : > { %s526_s19 = sshll.u32 (!%p162_p10), %s604_s18, 4  ;;  %s527_s19 = int_to_ptr.vmem [resolvable:$false] %s526_s19 }
  0x13   : > { %s528_s21 = scalar_lea.vmem (!%p162_p10), %s527_s19, 512 }
  0x15   : > { %216 = vperm.xlu0 (!%p162_p10), %519, %v205_v4   ;;  %226 = vperm.xlu1 (!%p162_p10), %520, %v207_v5  }
  0x16   : > { %s191_s28 = scalar_select %p190_p11, %s592_s15, 1 }
  0x17   : > { %s347_s15 = scalar_lea.sflag [#allocation3], %s186_s30 }
  0x18   : > { %s458_s4 = sshll.u32 %s191_s28, 3 }
  0x19   : > { %s197_s11 = scalar_lea.vmem %s765_s0, %s458_s4  ;;  %s444_s4 = sshll.u32 %s186_s30, 4 }
  0x1a   : > { %v208_v6 = vld [vmem:[%s197_s11] sm:$0xff]  ;;  %s188_s6 = scalar_lea.vmem [#allocation2], %s444_s4 }
  0x1b   : > { %v230_v7 = vcombine.high %v208_v6, %v208_v6  ;;  %s363_s7 = sshll.u32 %s188_s6, 4  ;;  %s718_s7 = int_to_ptr.vmem [resolvable:$true] %s363_s7 }
  0x1c   : > { %s522_s11 = scalar_lea.vmem %s718_s7, 256  ;;  %p529_p1 = scmp.lt.s32.totalorder %s718_s7, %s527_s19 }
  0x1d   : > { %447 = vmatprep.subr.msk.mxu0 %vm244_vm0, %v230_v7  ;;  %460 = vmatprep.subr.msk.mxu1 %vm244_vm0, %v230_v7  ;;  %p523_p12 = scmp.ne.s32.totalorder %s718_s7, %s522_s11  ;;  %p530_p2 = scmp.lt.s32.totalorder %s528_s21, %s522_s11 }
  0x1e   : > { %448 = vmatpush1.msk.msra.mxu0 %vm244_vm0, %v208_v6  ;;  %461 = vmatpush1.msk.msra.mxu1 %vm244_vm0, %v208_v6 }
  0x1f   : > { %449 = vmatmul.mubr.msk.f32.vlgmr.msra.gmra.mrb[0].mxu0 %vm231_vm1, %v200_v8  ;;  %451 = vmatmul.mubr.msk.f32.vlgmr.msra.gmra.mrb[0].mxu1 %vm231_vm1, %v202_v9  ;;  %p524_p13 = pnand %p523_p12, %p665_p4  ;;  %p531_p3 = por %p530_p2, %p529_p1 }
  0x20   : > { %319 = vmatprep.mubr.f32.mxu0 %v602_v0  ;;  %331 = vmatprep.mubr.f32.mxu1 %v602_v0 }
  0x21   : > { %p525_p0 = pneg %p524_p13 }
  0x23   : > { %450 = vmatmul.mubr.msk.f32.gmra.mrb[2].mxu0 %vm231_vm1, %v201_v10  ;;  %452 = vmatmul.mubr.msk.f32.gmra.mrb[2].mxu1 %vm231_vm1, %v203_v11  ;;  %p532_p5 = pnand %p531_p3, %p525_p0 }
  0x90   : > { %v212_v12 = vpop.permute.xlu0 %211  ;;  %v222_v13 = vpop.permute.xlu1 %221 }
  0x94   : > { %v217_v18 = vpop.permute.xlu0 %216  ;;  %v227_v26 = vpop.permute.xlu1 %226 }
  0xf2   : > { %v315_v14 = vpop.f32.mrb[0].mxu0  ;;  %v327_v15 = vpop.f32.mrb[0].mxu1 }
  0xf3   : > { %v317_v16 = vpop.f32.mrb[1].mxu0  ;;  %v329_v17 = vpop.f32.mrb[1].mxu1  ;;  %v316_v21 = vadd.f32 %v315_v14, %v212_v12  ;;  %v328_v28 = vadd.f32 %v327_v15, %v222_v13 }
  0xf4   : > { %v318_v25 = vadd.f32 %v317_v16, %v212_v12  ;;  %v330_v30 = vadd.f32 %v329_v17, %v222_v13 }
  0xf6   : > { %v321_v19 = vpop.f32.mrb[2].mxu0  ;;  %v333_v20 = vpop.f32.mrb[2].mxu1 }
  0xf7   : > { %v322_v22 = vadd.f32 %v321_v19, %v217_v18  ;;  %v323_v23 = vpop.f32.mrb[3].mxu0  ;;  %v335_v24 = vpop.f32.mrb[3].mxu1  ;;  %v334_v32 = vadd.f32 %v333_v20, %v227_v26 }
  0xf8   : > { %v324_v27 = vadd.f32 %v323_v23, %v217_v18  ;;  %v336_v34 = vadd.f32 %v335_v24, %v227_v26 }
  0xf9   : > { %v338_v29 = vmax.f32 %v316_v21, %v322_v22 }
  0xfa   : > { %v339_v31 = vmax.f32 %v318_v25, %v324_v27 }
  0xfb   : > { %v340_v33 = vmax.f32 %v338_v29, %v328_v28 }
  0xfc   : > { %v341_v35 = vmax.f32 %v339_v31, %v330_v30 }
  0xfd   : > { %v342_v36 = vmax.f32 %v340_v33, %v334_v32 }
  0xfe   : > { %v343_v37 = vmax.f32 %v341_v35, %v336_v34 }
  0xff   : > { %344 = vst [vmem:[%s188_s6] sm:$0xff] %v342_v36 }
 0x100   : > { %345 = vst [vmem:[%s188_s6 + $0x8] sm:$0xff] %v343_v37 }
 0x101   : > { %535 = shalt.err (!%p532_p5)
}
 0x102   : > { %s536_s23 = scalar_lea.hbm %s716_s10, 256  ;;  %s540_s28 = scalar_lea.hbm %s768_s3, 512 }
 0x103   : > { %p537_p6 = scmp.ne.s32.totalorder %s716_s10, %s536_s23  ;;  %p541_p10 = scmp.lt.u32.totalorder %s716_s10, %s768_s3 }
 0x104   : > { %p542_p11 = scmp.lt.u32.totalorder %s540_s28, %s536_s23  ;;  %p544_p13 = scmp.lt.u32.totalorder %s536_s23, %s716_s10 }
 0x105   : > { %p538_p7 = pnand %p537_p6, %p665_p4 }
 0x106   : > { %p543_p12 = por %p542_p11, %p541_p10 }
 0x107   : > { %p539_p9 = pneg %p538_p7 }
 0x108   : > { %p545_p0 = por %p544_p13, %p543_p12 }
 0x10a   : > { %p546_p1 = pnand %p545_p0, %p539_p9 }
 0x10c   : > { %549 = shalt.err (!%p546_p1)
}
 0x10d   : > { %462 = dma.vmem_to_hbm [thread:$0]  (%p665_p4), %s718_s7, 256, %s716_s10, %s347_s15  }
 0x10e PF: > { %p468_p2 = scmp.ge.s32.totalorder %s600_s17, 2  ;;  %s375_s4 = sand.u32 1, %s580_s12  }
 0x10f   : > { %s376_s5 = scalar_lea.sflag [#allocation3], %s375_s4 }
 0x110   : > { %p465_p3 = pnand %p468_p2, %p672_p8 }
 0x112   : > { %575 = dma.done.wait (!%p465_p3), %s376_s5, 256  }
 0x113   : > { %577 = vsyncadd (!%p465_p3), %s376_s5, 4294967040  ;;  %s16_s17 = sadd.s32 1, %s600_s17   ;;  %s771_s12 = smov %s584_s13 }
 0x114   : > { %p13_p5 = scmp.ge.s32.totalorder %s16_s17, 4   ;;  %s772_s13 = smov %s588_s14 }
 0x115   : > { %s773_s14 = smov %s678_s25  ;;  %s774_s15 = smov %s596_s16 }
 0x116   : > { %s775_s16 = smov %s777_s20  ;;  %15 = sbr.rel (!%p13_p5) target bundleno = 4 (0x4), region = 67 }
 0x11d   :  { %381 = vsyncpa [#allocation3], 1 }
 0x11e   :  { %383 = vsyncpa [#allocation3 + $0x1], 1 }

</bundles_post_ra>
